<compile_context>
chip_gen: v6e
topology: v6e:2x2x1
jax: 0.10.0
libtpu: 0.0.40
codegen_flags: <defaults>
</compile_context>

<pallas_src>
import jax
import jax.numpy as jnp
from jax.experimental import pallas as pl
from jax.experimental.pallas import tpu as pltpu

LANE = 128


def _round_up(n, m):
    return ((n + m - 1) // m) * m


def make_nn2_kernel(n_layers):
    """Kernel over one (TB, in_features) batch tile; weights/biases resident in VMEM."""

    def kernel(*refs):
        x_ref, o_ref = refs[0], refs[-1]
        h = x_ref[...].astype(jnp.bfloat16)               # (TB, in_f) f32 -> bf16 in VPU
        for li in range(n_layers):
            w_ref = refs[1 + 2 * li]                      # (in_pad, out_pad) bf16
            b_ref = refs[2 + 2 * li]                      # (1,      out_pad) f32
            if li > 0:
                # leaky_relu (PyTorch default negative_slope=0.01), single VALU max
                h = jnp.maximum(h, 0.01 * h)
                h = h.astype(jnp.bfloat16)
            h = jnp.dot(h, w_ref[...],
                        preferred_element_type=jnp.float32) + b_ref[...]
        # softmax over the lane axis; padded logits of the last layer carry a -1e30
        # bias -> exp() == 0, so padding contributes nothing to the denominator.
        z = h - jnp.max(h, axis=-1, keepdims=True)
        e = jnp.exp(z)
        inv = pl.reciprocal(jnp.sum(e, axis=-1, keepdims=True), approx=True)  # EUP
        o_ref[...] = (e * inv).astype(o_ref.dtype)        # bf16 lane-dense store

    return kernel


def prepare_params(params):
    """One-time host-side prep of PyTorch-layout params.

    Each layer (w: (out, in) f32, b: (out,) f32) becomes:
      w_p: (in_pad, out_pad) bf16  -- pre-transposed; out dim padded to 128 lanes.
                                      First layer keeps its TRUE input width (so the
                                      kernel can read the caller's un-padded x);
                                      later layers pad the input dim to 128 to match
                                      the previous layer's padded output.
      b_p: (1, out_pad)      f32   -- zero-padded; LAST layer's padding is -1e30 so
                                      the padded logits vanish under softmax.
    """
    prepped = []
    n = len(params)
    for li, (w, b) in enumerate(params):
        out_f, in_f = w.shape
        in_pad = in_f if li == 0 else _round_up(in_f, LANE)
        out_pad = _round_up(out_f, LANE)
        w_p = jnp.zeros((in_pad, out_pad), jnp.float32).at[:in_f, :out_f].set(w.T)
        pad_val = -1e30 if li == n - 1 else 0.0
        b_p = jnp.full((1, out_pad), pad_val, jnp.float32).at[0, :out_f].set(
            b.reshape(-1))
        prepped.append((w_p.astype(jnp.bfloat16), b_p))
    return prepped


def nn2_forward(x, prepped, out_size, *, block_b=2048):
    """x: (B, in_features) f32; prepped: output of prepare_params."""
    B, in_f = x.shape
    n_layers = len(prepped)
    out_pad = prepped[-1][0].shape[1]

    # Batch tile: multiple of 8 sublanes, capped at block_b, and at most half the
    # (8-rounded) batch so the grid has >= 2 steps (engages the second TC on v7x
    # and gives the DMA pipeline something to overlap).
    b8 = _round_up(max(B, 8), 8)
    half = max(8, (b8 // 2) // 8 * 8)
    tb = min(block_b, half)
    b_pad = _round_up(b8, tb)
    num_steps = b_pad // tb

    # Only a (cheap, narrow) batch pad when needed; the feature dim is never padded.
    if b_pad != B:
        x_in = jnp.zeros((b_pad, in_f), x.dtype).at[:B, :].set(x)
    else:
        x_in = x

    if num_steps >= 3:
        x_spec = pl.BlockSpec((tb, in_f), lambda i: (i, 0),
                              pipeline_mode=pl.Buffered(3))   # hide DMA latency
    else:
        x_spec = pl.BlockSpec((tb, in_f), lambda i: (i, 0))

    in_specs = [x_spec]
    flat_args = [x_in]
    for w, b in prepped:
        in_specs.append(pl.BlockSpec(w.shape, lambda i: (0, 0)))  # resident weight
        in_specs.append(pl.BlockSpec(b.shape, lambda i: (0, 0)))  # resident bias
        flat_args += [w, b]

    out = pl.pallas_call(
        make_nn2_kernel(n_layers),
        out_shape=jax.ShapeDtypeStruct((b_pad, out_pad), jnp.bfloat16),
        grid=(num_steps,),
        in_specs=in_specs,
        out_specs=pl.BlockSpec((tb, out_pad), lambda i: (i, 0)),
        compiler_params=pltpu.CompilerParams(
            dimension_semantics=("parallel",),      # shard batch tiles across TCs (v7x)
            vmem_limit_bytes=32 * 1024 * 1024,      # safe on v5e/v6e/v7x at tb<=2048
        ),
    )(*flat_args)

    # NOTE: this slice is an extra HBM pass; consumers that can accept the padded
    # (b_pad, out_pad) bf16 buffer should take `out` directly instead.
    return out[:B, :out_size].astype(jnp.float32)


def init_linear(key, in_size, out_size):
    # mimic PyTorch nn.Linear default init: U(-1/sqrt(fan_in), 1/sqrt(fan_in))
    kw, kb = jax.random.split(key)
    bound = 1.0 / jnp.sqrt(jnp.float32(in_size))
    w = jax.random.uniform(kw, (out_size, in_size), jnp.float32, -bound, bound)
    b = jax.random.uniform(kb, (out_size,), jnp.float32, -bound, bound)
    return w, b


def nn2_reference(x, params):
    # pure-JAX f32 reference of the PyTorch forward
    h = x
    for i, (w, b) in enumerate(params):
        if i > 0:
            h = jnp.where(h >= 0.0, h, 0.01 * h)
        h = h @ w.T + b[None, :]
    z = h - jnp.max(h, axis=-1, keepdims=True)
    e = jnp.exp(z)
    return e / jnp.sum(e, axis=-1, keepdims=True)


if __name__ == "__main__":
    # NN2(inSize=16, outSize=8, layers=[32, 32])
    in_size, out_size, hidden = 16, 8, [32, 32]
    batch = 2

    key = jax.random.PRNGKey(0)
    k_x, k0, k1, k2 = jax.random.split(key, 4)

    params = [
        init_linear(k0, in_size, hidden[0]),
        init_linear(k1, hidden[0], hidden[1]),
        init_linear(k2, hidden[1], out_size),
    ]
    x = jax.random.normal(k_x, (batch, in_size), jnp.float32)

    prepped = prepare_params(params)  # one-time host-side transpose/pad/bf16

    fwd = jax.jit(nn2_forward, static_argnames=("out_size", "block_b"))
    out = fwd(x, prepped, out_size=out_size)
    out = jax.block_until_ready(out)

    # sanity: shape, softmax rows sum to ~1 (bf16-stored probs), close to f32 reference
    assert out.shape == (batch, out_size)
    assert bool(jnp.all(jnp.abs(jnp.sum(out, axis=-1) - 1.0) < 2e-2))
    ref = nn2_reference(x, params)
    assert bool(jnp.all(jnp.abs(out - ref) < 5e-2))  # loose: bf16 MXU operands + bf16 store

    print("KERNEL_OK")
</pallas_src>

<mosaic_0001>
module attributes {stable_mosaic.version = 11 : i64} {
  func.func @kernel(%arg0: i32, %arg1: memref<8x16xf32, #tpu.memory_space<vmem>>, %arg2: memref<16x128xbf16, #tpu.memory_space<vmem>>, %arg3: memref<1x128xf32, #tpu.memory_space<vmem>>, %arg4: memref<128x128xbf16, #tpu.memory_space<vmem>>, %arg5: memref<1x128xf32, #tpu.memory_space<vmem>>, %arg6: memref<128x128xbf16, #tpu.memory_space<vmem>>, %arg7: memref<1x128xf32, #tpu.memory_space<vmem>>, %arg8: memref<8x128xbf16, #tpu.memory_space<vmem>>) attributes {dimension_semantics = [#tpu.dimension_semantics<parallel>], iteration_bounds = array<i64: 1>, scalar_prefetch = 0 : i64, scratch_operands = 0 : i64, tpu.core_type = #tpu.core_type<tc>, window_params = [{transform_indices = @transform_0, window_bounds = array<i64: 8, 16>}, {pipeline_mode = #tpu.pipeline_mode<synchronous>, transform_indices = @transform_1, window_bounds = array<i64: 16, 128>}, {pipeline_mode = #tpu.pipeline_mode<synchronous>, transform_indices = @transform_2, window_bounds = array<i64: 1, 128>}, {pipeline_mode = #tpu.pipeline_mode<synchronous>, transform_indices = @transform_3, window_bounds = array<i64: 128, 128>}, {pipeline_mode = #tpu.pipeline_mode<synchronous>, transform_indices = @transform_4, window_bounds = array<i64: 1, 128>}, {pipeline_mode = #tpu.pipeline_mode<synchronous>, transform_indices = @transform_5, window_bounds = array<i64: 128, 128>}, {pipeline_mode = #tpu.pipeline_mode<synchronous>, transform_indices = @transform_6, window_bounds = array<i64: 1, 128>}, {transform_indices = @transform_7, window_bounds = array<i64: 8, 128>}]} {
    %c0 = arith.constant 0 : index
    %c0_0 = arith.constant 0 : index
    %0 = vector.load %arg1[%c0, %c0_0] : memref<8x16xf32, #tpu.memory_space<vmem>>, vector<8x16xf32>
    %1 = arith.truncf %0 : vector<8x16xf32> to vector<8x16xbf16>
    %c0_1 = arith.constant 0 : index
    %c0_2 = arith.constant 0 : index
    %2 = vector.load %arg2[%c0_1, %c0_2] : memref<16x128xbf16, #tpu.memory_space<vmem>>, vector<16x128xbf16>
    %cst = arith.constant dense<0.000000e+00> : vector<8x128xf32>
    %3 = tpu.matmul %1, %2, %cst {dimension_numbers = #tpu.dot_dimension_numbers<[1], [0], [0], [1], [0, 0, 1, 1], [], []>} : vector<8x16xbf16>, vector<16x128xbf16>, vector<8x128xf32> -> vector<8x128xf32>
    %c0_3 = arith.constant 0 : index
    %c0_4 = arith.constant 0 : index
    %4 = vector.load %arg3[%c0_3, %c0_4] : memref<1x128xf32, #tpu.memory_space<vmem>>, vector<1x128xf32>
    %5 = vector.broadcast %4 : vector<1x128xf32> to vector<8x128xf32>
    %6 = arith.addf %3, %5 : vector<8x128xf32>
    %cst_5 = arith.constant 0.00999999977 : f32
    %7 = vector.broadcast %cst_5 : f32 to vector<8x128xf32>
    %8 = arith.mulf %7, %6 : vector<8x128xf32>
    %9 = arith.maximumf %6, %8 : vector<8x128xf32>
    %10 = arith.truncf %9 : vector<8x128xf32> to vector<8x128xbf16>
    %c0_6 = arith.constant 0 : index
    %c0_7 = arith.constant 0 : index
    %11 = vector.load %arg4[%c0_6, %c0_7] : memref<128x128xbf16, #tpu.memory_space<vmem>>, vector<128x128xbf16>
    %cst_8 = arith.constant dense<0.000000e+00> : vector<8x128xf32>
    %12 = tpu.matmul %10, %11, %cst_8 {dimension_numbers = #tpu.dot_dimension_numbers<[1], [0], [0], [1], [0, 0, 1, 1], [], []>} : vector<8x128xbf16>, vector<128x128xbf16>, vector<8x128xf32> -> vector<8x128xf32>
    %c0_9 = arith.constant 0 : index
    %c0_10 = arith.constant 0 : index
    %13 = vector.load %arg5[%c0_9, %c0_10] : memref<1x128xf32, #tpu.memory_space<vmem>>, vector<1x128xf32>
    %14 = vector.broadcast %13 : vector<1x128xf32> to vector<8x128xf32>
    %15 = arith.addf %12, %14 : vector<8x128xf32>
    %cst_11 = arith.constant 0.00999999977 : f32
    %16 = vector.broadcast %cst_11 : f32 to vector<8x128xf32>
    %17 = arith.mulf %16, %15 : vector<8x128xf32>
    %18 = arith.maximumf %15, %17 : vector<8x128xf32>
    %19 = arith.truncf %18 : vector<8x128xf32> to vector<8x128xbf16>
    %c0_12 = arith.constant 0 : index
    %c0_13 = arith.constant 0 : index
    %20 = vector.load %arg6[%c0_12, %c0_13] : memref<128x128xbf16, #tpu.memory_space<vmem>>, vector<128x128xbf16>
    %cst_14 = arith.constant dense<0.000000e+00> : vector<8x128xf32>
    %21 = tpu.matmul %19, %20, %cst_14 {dimension_numbers = #tpu.dot_dimension_numbers<[1], [0], [0], [1], [0, 0, 1, 1], [], []>} : vector<8x128xbf16>, vector<128x128xbf16>, vector<8x128xf32> -> vector<8x128xf32>
    %c0_15 = arith.constant 0 : index
    %c0_16 = arith.constant 0 : index
    %22 = vector.load %arg7[%c0_15, %c0_16] : memref<1x128xf32, #tpu.memory_space<vmem>>, vector<1x128xf32>
    %23 = vector.broadcast %22 : vector<1x128xf32> to vector<8x128xf32>
    %24 = arith.addf %21, %23 : vector<8x128xf32>
    %cst_17 = arith.constant dense<0xFF800000> : vector<8xf32>
    %25 = vector.multi_reduction <maximumf>, %24, %cst_17 [1] : vector<8x128xf32> to vector<8xf32>
    %26 = vector.shape_cast %25 : vector<8xf32> to vector<8x1xf32>
    %27 = vector.broadcast %26 : vector<8x1xf32> to vector<8x128xf32>
    %28 = arith.subf %24, %27 : vector<8x128xf32>
    %29 = math.exp %28 : vector<8x128xf32>
    %cst_18 = arith.constant dense<0.000000e+00> : vector<8xf32>
    %30 = vector.multi_reduction <add>, %29, %cst_18 [1] : vector<8x128xf32> to vector<8xf32>
    %31 = vector.shape_cast %30 : vector<8xf32> to vector<8x1xf32>
    %32 = tpu.reciprocal %31 {approx = true} : vector<8x1xf32> -> vector<8x1xf32>
    %33 = vector.broadcast %32 : vector<8x1xf32> to vector<8x128xf32>
    %34 = arith.mulf %29, %33 : vector<8x128xf32>
    %35 = arith.truncf %34 : vector<8x128xf32> to vector<8x128xbf16>
    %c0_19 = arith.constant 0 : index
    %c0_20 = arith.constant 0 : index
    %36 = vector.load %arg8[%c0_19, %c0_20] : memref<8x128xbf16, #tpu.memory_space<vmem>>, vector<8x128xbf16>
    tpu.vector_store %arg8[%c0_19, %c0_20], %35 {strides = array<i32>} : memref<8x128xbf16, #tpu.memory_space<vmem>>, vector<8x128xbf16>,
    return
  }
  func.func @transform_0(%arg0: i32) -> (i32, i32) {
    %c0_i32 = arith.constant 0 : i32
    %c0_i32_0 = arith.constant 0 : i32
    return %arg0, %c0_i32 : i32, i32
  }
  func.func @transform_1(%arg0: i32) -> (i32, i32) {
    %c0_i32 = arith.constant 0 : i32
    %c0_i32_0 = arith.constant 0 : i32
    %c0_i32_1 = arith.constant 0 : i32
    return %c0_i32, %c0_i32_0 : i32, i32
  }
  func.func @transform_2(%arg0: i32) -> (i32, i32) {
    %c0_i32 = arith.constant 0 : i32
    %c0_i32_0 = arith.constant 0 : i32
    %c0_i32_1 = arith.constant 0 : i32
    return %c0_i32, %c0_i32_0 : i32, i32
  }
  func.func @transform_3(%arg0: i32) -> (i32, i32) {
    %c0_i32 = arith.constant 0 : i32
    %c0_i32_0 = arith.constant 0 : i32
    %c0_i32_1 = arith.constant 0 : i32
    return %c0_i32, %c0_i32_0 : i32, i32
  }
  func.func @transform_4(%arg0: i32) -> (i32, i32) {
    %c0_i32 = arith.constant 0 : i32
    %c0_i32_0 = arith.constant 0 : i32
    %c0_i32_1 = arith.constant 0 : i32
    return %c0_i32, %c0_i32_0 : i32, i32
  }
  func.func @transform_5(%arg0: i32) -> (i32, i32) {
    %c0_i32 = arith.constant 0 : i32
    %c0_i32_0 = arith.constant 0 : i32
    %c0_i32_1 = arith.constant 0 : i32
    return %c0_i32, %c0_i32_0 : i32, i32
  }
  func.func @transform_6(%arg0: i32) -> (i32, i32) {
    %c0_i32 = arith.constant 0 : i32
    %c0_i32_0 = arith.constant 0 : i32
    %c0_i32_1 = arith.constant 0 : i32
    return %c0_i32, %c0_i32_0 : i32, i32
  }
  func.func @transform_7(%arg0: i32) -> (i32, i32) {
    %c0_i32 = arith.constant 0 : i32
    %c0_i32_0 = arith.constant 0 : i32
    return %arg0, %c0_i32 : i32, i32
  }
}

</mosaic_0001>

<bundles_post_ra>
// kernel: nn2_forward.1
= control target key start
LH: loop header
LB: loop body
LE: loop exit
PB: predicated region body
PF: predicated region fallthrough
CT: control target
= control target key end

     0   :  { %12 = vsyncpa [#allocation3], 0  ;;  %s609_s0 = inlined_call_operand.vmem [shape: f32[8,16], index: 0, kind: input, shape index: {}]   ;;  %s610_s1 = inlined_call_operand.vmem [shape: bf16[16,128], index: 1, kind: input, shape index: {}]   ;;  %s611_s2 = inlined_call_operand.vmem [shape: f32[1,128], index: 2, kind: input, shape index: {}]   ;;  %s612_s3 = inlined_call_operand.hbm [shape: bf16[128,128], index: 3, kind: input, shape index: {}]   ;;  %s613_s4 = inlined_call_operand.vmem [shape: f32[1,128], index: 4, kind: input, shape index: {}]   ;;  %s614_s5 = inlined_call_operand.hbm [shape: bf16[128,128], index: 5, kind: input, shape index: {}]   ;;  %s615_s6 = inlined_call_operand.vmem [shape: f32[1,128], index: 6, kind: input, shape index: {}]   ;;  %s616_s7 = inlined_call_operand.vmem [shape: bf16[8,128], index: 7, kind: output, shape index: {}]  }
   0x1   :  { %13 = vsyncpa [#allocation5], 0  ;;  %s519_s24 = smov [#allocation2]  }
   0x2   :  { %s25_s25 = sshll.u32 %s519_s24, 4  ;;  %s26_s25 = int_to_ptr.vmem [resolvable:$true] %s25_s25 }
   0x3   :  { %s483_s26 = scalar_lea.vmem %s26_s25, 1024  ;;  %p488_p1 = scmp.lt.s32.totalorder %s26_s25, %s26_s25 }
   0x4   :  { %p484_p0 = scmp.ne.s32.totalorder %s26_s25, %s483_s26  ;;  %p489_p2 = scmp.lt.s32.totalorder %s483_s26, %s483_s26 }
   0x6   :  { %p490_p3 = por %p489_p2, %p488_p1 }
   0x8   :  { %p491_p4 = pnand %p490_p3, %p484_p0 }
   0xa   :  { %494 = shalt.err (!%p491_p4)
}
   0xb   :  { %s520_s27 = smov 64   ;;  %s521_s28 = smov 4  }
   0xc   :  { %31 = dma.hbm_to_vmem [thread:$0]  %s612_s3, 1024, %s26_s25, [#allocation3], %s520_s27, %s520_s27, %s521_s28  }
   0xd   :  { %s522_s8 = smov [#allocation4]  }
   0xe   :  { %s39_s9 = sshll.u32 %s522_s8, 4  ;;  %s40_s9 = int_to_ptr.vmem [resolvable:$true] %s39_s9 }
   0xf   :  { %s503_s10 = scalar_lea.vmem %s40_s9, 1024  ;;  %p508_p6 = scmp.lt.s32.totalorder %s40_s9, %s40_s9 }
  0x10   :  { %p504_p5 = scmp.ne.s32.totalorder %s40_s9, %s503_s10  ;;  %p509_p7 = scmp.lt.s32.totalorder %s503_s10, %s503_s10 }
  0x12   :  { %p510_p8 = por %p509_p7, %p508_p6 }
  0x14   :  { %p511_p9 = pnand %p510_p8, %p504_p5 }
  0x16   :  { %514 = shalt.err (!%p511_p9)
}
  0x17   :  { %45 = dma.hbm_to_vmem [thread:$0]  %s614_s5, 1024, %s40_s9, [#allocation5], %s520_s27, %s520_s27, %s521_s28  }
  0x18   :  { %515 = dma.done.wait [#allocation3], 1024  }
  0x19   :  { %516 = vsyncadd [#allocation3], 4294966272 }
  0x1a   :  { %517 = dma.done.wait [#allocation5], 1024  }
  0x1b   :  { %518 = vsyncadd [#allocation5], 4294966272  ;;  %v523_v0 = vmov 0.0   ;;  %vm524_vm0 = vmmov 0   ;;  %v454_v1 = vld [vmem:[%s610_s1] sm:$0xff]   ;;  %vm72_vm1 = vcmask 130048  }
  0x1c   :  { %402 = vmatprep.subr.bf16.mxu0 %v523_v0  ;;  %404 = vmatprep.mubr.msk.bf16.mxu0 %vm524_vm0, %v523_v0  ;;  %v55_v2 = vld [vmem:[%s609_s0] sm:$0xff]  ;;  %v455_v4 = vld [vmem:[#allocation2 + $0x38] sm:$0xff]   ;;  %v456_v5 = vld [vmem:[#allocation2 + $0x30] sm:$0xff]  }
  0x1d   :  { %408 = vmatprep.subr.bf16.mxu1 %v523_v0  ;;  %424 = vmatprep.mubr.msk.bf16.mxu1 %vm524_vm0, %v523_v0  ;;  %v56_v3 = vpack.c.bf16 %v55_v2, %v55_v2  ;;  %v457_v6 = vld [vmem:[#allocation2 + $0x28] sm:$0xff]   ;;  %v458_v7 = vld [vmem:[#allocation2 + $0x20] sm:$0xff]   ;;  %v459_v8 = vld [vmem:[#allocation2 + $0x18] sm:$0xff]  }
  0x1e   :  { %403 = vmatpush3.bf16.msra.mxu0 %v454_v1  ;;  %409 = vmatpush3.bf16.msra.mxu1 %v455_v4  ;;  %v460_v9 = vld [vmem:[#allocation2 + $0x10] sm:$0xff]   ;;  %v461_v10 = vld [vmem:[#allocation2 + $0x8] sm:$0xff]   ;;  %v462_v11 = vld [vmem:[#allocation2] sm:$0xff]  }
  0x1f   :  { %428 = vmatprep.subr.bf16.mxu0 %v523_v0  ;;  %410 = vmatprep.subr.bf16.mxu1 %v523_v0  ;;  %v463_v12 = vld [vmem:[#allocation4 + $0x38] sm:$0xff]   ;;  %v464_v13 = vld [vmem:[#allocation4 + $0x30] sm:$0xff]   ;;  %v465_v14 = vld [vmem:[#allocation4 + $0x28] sm:$0xff]  }
  0x20   :  { %v466_v15 = vld [vmem:[#allocation4 + $0x20] sm:$0xff]   ;;  %v467_v16 = vld [vmem:[#allocation4 + $0x18] sm:$0xff]   ;;  %v468_v17 = vld [vmem:[#allocation4 + $0x10] sm:$0xff]  }
  0x21   :  { %405 = vmatmul.mubr.msk.bf16.vlgmr.msra.gmra.mxu0 %vm72_vm1, %v56_v3  ;;  %v361_v18 = vld [vmem:[%s611_s2] ss:$0 sm:$0xff]  ;;  %v469_v27 = vld [vmem:[#allocation4 + $0x8] sm:$0xff]  }
  0x22   :  { %444 = vmatprep.mubr.msk.bf16.mxu0 %vm524_vm0, %v523_v0  ;;  %411 = vmatpush3.bf16.msra.mxu1 %v456_v5  ;;  %v470_v28 = vld [vmem:[#allocation4] sm:$0xff]  }
  0x23   :  { %412 = vmatprep.subr.bf16.mxu1 %v523_v0  ;;  %429 = vmatpush3.bf16.msra.mxu0 %v463_v12  ;;  %v364_v29 = vld [vmem:[%s613_s4] ss:$0 sm:$0xff] }
  0x24   :  { %430 = vmatprep.subr.bf16.mxu0 %v523_v0  ;;  %v373_v38 = vld [vmem:[%s615_s6] ss:$0 sm:$0xff] }
  0x26   :  { %413 = vmatpush3.bf16.msra.mxu1 %v457_v6 }
  0x27   :  { %414 = vmatprep.subr.bf16.mxu1 %v523_v0  ;;  %431 = vmatpush3.bf16.msra.mxu0 %v464_v13 }
  0x28   :  { %432 = vmatprep.subr.bf16.mxu0 %v523_v0 }
  0x2a   :  { %415 = vmatpush3.bf16.msra.mxu1 %v458_v7 }
  0x2b   :  { %416 = vmatprep.subr.bf16.mxu1 %v523_v0  ;;  %433 = vmatpush3.bf16.msra.mxu0 %v465_v14 }
  0x2c   :  { %434 = vmatprep.subr.bf16.mxu0 %v523_v0 }
  0x2e   :  { %417 = vmatpush3.bf16.msra.mxu1 %v459_v8 }
  0x2f   :  { %418 = vmatprep.subr.bf16.mxu1 %v523_v0  ;;  %435 = vmatpush3.bf16.msra.mxu0 %v466_v15 }
  0x30   :  { %436 = vmatprep.subr.bf16.mxu0 %v523_v0 }
  0x32   :  { %419 = vmatpush3.bf16.msra.mxu1 %v460_v9 }
  0x33   :  { %420 = vmatprep.subr.bf16.mxu1 %v523_v0  ;;  %437 = vmatpush3.bf16.msra.mxu0 %v467_v16 }
  0x34   :  { %438 = vmatprep.subr.bf16.mxu0 %v523_v0 }
  0x36   :  { %421 = vmatpush3.bf16.msra.mxu1 %v461_v10 }
  0x37   :  { %422 = vmatprep.subr.bf16.mxu1 %v523_v0  ;;  %439 = vmatpush3.bf16.msra.mxu0 %v468_v17 }
  0x38   :  { %440 = vmatprep.subr.bf16.mxu0 %v523_v0 }
  0x3a   :  { %423 = vmatpush3.bf16.msra.mxu1 %v462_v11 }
  0x3b   :  { %441 = vmatpush3.bf16.msra.mxu0 %v469_v27 }
  0x3c   :  { %442 = vmatprep.subr.bf16.mxu0 %v523_v0 }
  0x3f   :  { %443 = vmatpush3.bf16.msra.mxu0 %v470_v28 }
  0xe1   :  { %v110_v19 = vpop.f32.mrf.mxu0 }
  0xe2   :  { %v111_v20 = vadd.f32 %v361_v18, %v110_v19 }
  0xe3   :  { %v406_v21 = vpop.f32.mrf.mxu0 }
  0xe4   :  { %v116_v22 = vmul.f32 0.01, %v111_v20 }
  0xe5   :  { %v113_v23 = vpop.f32.mrf.mxu0 }
  0xe6   :  { %v117_v24 = vmax.f32 %v111_v20, %v116_v22 }
  0xe7   :  { %v407_v25 = vpop.f32.mrf.mxu0 }
  0xe8   :  { %v118_v26 = vpack.c.bf16 %v117_v24, %v117_v24 }
  0xea   :  { %425 = vmatmul.mubr.bf16.vlgmr.msra.gmra.mxu1 %v118_v26 }
 0x1aa   :  { %v224_v30 = vpop.f32.mrf.mxu1 }
 0x1ab   :  { %v225_v31 = vadd.f32 %v364_v29, %v224_v30 }
 0x1ac   :  { %v426_v32 = vpop.f32.mrf.mxu1 }
 0x1ad   :  { %v230_v33 = vmul.f32 0.01, %v225_v31 }
 0x1ae   :  { %v227_v34 = vpop.f32.mrf.mxu1 }
 0x1af   :  { %v231_v35 = vmax.f32 %v225_v31, %v230_v33 }
 0x1b0   :  { %v427_v36 = vpop.f32.mrf.mxu1 }
 0x1b1   :  { %v232_v37 = vpack.c.bf16 %v231_v35, %v231_v35 }
 0x1b3   :  { %445 = vmatmul.mubr.bf16.vlgmr.msra.gmra.mxu0 %v232_v37 }
 0x273   :  { %v338_v39 = vpop.f32.mrf.mxu0 }
 0x274   :  { %v339_v40 = vadd.f32 %v373_v38, %v338_v39 }
 0x275   :  { %v446_v41 = vpop.f32.mrf.mxu0 }
 0x276   :  { %344 = vmax.xlane.f32.xlu0 %v339_v40 }
 0x277   :  { %v341_v42 = vpop.f32.mrf.mxu0 }
 0x279   :  { %v447_v43 = vpop.f32.mrf.mxu0 }
 0x2ff   :  { %v345_v44 = vpop.xlane.xlu0 %344 }
 0x300   :  { %v346_v45 = vsub.f32 %v339_v40, %v345_v44 }
 0x302   :  { %v347_v46 = vmul.f32 1.442695, %v346_v45 }
 0x304   :  { %471 = vpow2.f32 %v347_v46 }
 0x311   :  { %v472_v47 = vpop.eup %471 }
 0x312   :  { %349 = vadd.xlane.f32.xlu0 %v472_v47 }
 0x39b   :  { %v350_v48 = vpop.xlane.xlu0 %349 }
 0x39c   :  { %473 = vrcp.f32 %v350_v48 }
 0x3a9   :  { %v474_v49 = vpop.eup %473 }
 0x3aa   :  { %v352_v50 = vmul.f32 %v474_v49, %v472_v47 }
 0x3ac   :  { %v353_v51 = vpack.c.bf16 %v352_v50, %v352_v50 }
 0x3ae   :  { %354 = vst [vmem:[%s616_s7] sm:$0xf] %v353_v51 }
 0x3af   :  { %359 = vsyncpa [#allocation3], 1 }
 0x3b0   :  { %360 = vsyncpa [#allocation5], 1 }

</bundles_post_ra>
